<compile_context>
chip_gen: v7x
topology: tpu7x:2x2x1
jax: 0.10.0
libtpu: 0.0.40
codegen_flags: <defaults>
</compile_context>

<pallas_src>
import functools

import jax
import jax.numpy as jnp
from jax.experimental import pallas as pl
from jax.experimental.pallas import tpu as pltpu


_LANES = 128
_TARGET_BLOCK_BYTES = 4 << 20      # ~4 MiB per block (per perf review)
_SINGLE_BLOCK_BYTES = 256 << 10    # below this, one full-array block is fine
_VMEM_LIMIT_BYTES = 48 << 20       # 4 x 4 MiB double-buffered blocks << 48 MiB


def _round_up(a, b):
    return (a + b - 1) // b * b


def _mapping_kernel(x_ref, o_ref, *, scale, is_train):
    # Compute in f32 regardless of I/O dtype: HBM bytes (the bottleneck) are
    # unchanged and the VPU has huge slack; preserves PyTorch f32 floor
    # semantics for bf16 inputs.
    x = x_ref[...].astype(jnp.float32)
    # True divide (not reciprocal-multiply) so floor() matches PyTorch `//`
    # exactly at integer boundaries when 4*input_node is not a power of two.
    y = x / scale
    if not is_train:
        y = jnp.floor(y)
    o_ref[...] = ((y + 5.0) * 10.0).astype(o_ref.dtype)


def _mapping_jax(x, scale, is_train, out_dtype):
    """Plain-JAX path for tiny inputs / ragged tails (f32 arithmetic)."""
    y = x.astype(jnp.float32) / scale
    if not is_train:
        y = jnp.floor(y)
    return ((y + 5.0) * 10.0).astype(out_dtype)


def mapping_forward(x, input_node, is_train, donate_input=False):
    """Pallas equivalent of Mapping(input_node).forward(x, is_train)."""
    is_train = bool(is_train)
    orig_shape = x.shape
    orig_dtype = x.dtype
    n = int(x.size)
    scale = 4.0 * float(input_node)

    if jnp.issubdtype(orig_dtype, jnp.floating):
        io_dtype = orig_dtype                  # stream bf16 as bf16, f32 as f32
        out_dtype = orig_dtype
    else:
        # PyTorch promotion: int / int-scalar -> float32 ; int // int -> int.
        io_dtype = jnp.float32
        out_dtype = jnp.float32 if is_train else orig_dtype

    if n == 0:
        return jnp.zeros(orig_shape, out_dtype)

    flat = x.reshape(-1)
    if flat.dtype != io_dtype:
        flat = flat.astype(io_dtype)

    n_body = (n // _LANES) * _LANES
    if n_body == 0:
        # Fewer than 128 elements: a kernel launch is pure overhead.
        return _mapping_jax(flat, scale, is_train, out_dtype).reshape(orig_shape)

    rows = n_body // _LANES
    slab = flat[:n_body].reshape(rows, _LANES)   # zero-copy when n % 128 == 0

    itemsize = jnp.dtype(io_dtype).itemsize
    slab_bytes = rows * _LANES * itemsize
    # ~4 MiB blocks: 8192 rows for f32, 16384 for bf16; multiple of 8 sublanes.
    max_tile_rows = max(8, (_TARGET_BLOCK_BYTES // (_LANES * itemsize)) // 8 * 8)

    if slab_bytes <= _SINGLE_BLOCK_BYTES:
        # Small array: a single full-array block (always a legal block shape).
        tile_rows = rows
        grid_len = 1
    else:
        # Even grid of >= 4 blocks, each <= ~4 MiB, tile_rows a multiple of 8:
        # keeps input/output DMAs pipelined and lets both v7x TensorCores
        # stream their own half of the slab.
        n_blocks = _round_up(max(4, pl.cdiv(rows, max_tile_rows)), 2)
        tile_rows = min(max_tile_rows, _round_up(pl.cdiv(rows, n_blocks), 8))
        grid_len = pl.cdiv(rows, tile_rows)      # last block may be partial

    call_kwargs = {}
    if donate_input and slab.dtype == io_dtype:
        # Only beneficial when the caller actually donates x (halves peak HBM
        # footprint); otherwise XLA inserts a defensive copy, so default off.
        call_kwargs["input_output_aliases"] = {0: 0}

    out_slab = pl.pallas_call(
        functools.partial(_mapping_kernel, scale=scale, is_train=is_train),
        out_shape=jax.ShapeDtypeStruct((rows, _LANES), io_dtype),
        grid=(grid_len,),
        in_specs=[pl.BlockSpec((tile_rows, _LANES), lambda i: (i, 0))],
        out_specs=pl.BlockSpec((tile_rows, _LANES), lambda i: (i, 0)),
        compiler_params=pltpu.CompilerParams(
            dimension_semantics=("parallel",),
            vmem_limit_bytes=_VMEM_LIMIT_BYTES),
        cost_estimate=pl.CostEstimate(
            flops=3 * n_body,
            transcendentals=0,
            bytes_accessed=2 * n_body * itemsize),
        **call_kwargs,
    )(slab)

    body_out = out_slab.reshape(-1)
    if body_out.dtype != out_dtype:
        body_out = body_out.astype(out_dtype)

    if n_body < n:
        # Ragged tail (< 128 elements): plain JAX, no full-array pad/slice.
        tail_out = _mapping_jax(flat[n_body:], scale, is_train, out_dtype)
        return jnp.concatenate([body_out, tail_out]).reshape(orig_shape)
    return body_out.reshape(orig_shape)


def mapping_reference(x, input_node, is_train):
    """Plain-JAX reference mirroring the PyTorch module (f32 arithmetic)."""
    scale = 4.0 * float(input_node)
    y = x.astype(jnp.float32) / scale
    if not is_train:
        y = jnp.floor(y)
    y = (y + 5.0) * 10.0
    if jnp.issubdtype(x.dtype, jnp.floating):
        return y.astype(x.dtype)
    return y.astype(jnp.float32 if is_train else x.dtype)


if __name__ == "__main__":
    key = jax.random.PRNGKey(0)
    input_node = 4

    def run_case(x, is_train, atol=1e-4, rtol=1e-5):
        out = jax.block_until_ready(mapping_forward(x, input_node, is_train))
        ref = mapping_reference(x, input_node, is_train)
        if out.shape != ref.shape or out.dtype != ref.dtype:
            return False
        return bool(jnp.allclose(out.astype(jnp.float32), ref.astype(jnp.float32),
                                 atol=atol, rtol=rtol))

    k1, k2, k3 = jax.random.split(key, 3)
    # Small NCHW input consistent with an ONN pipeline.
    x_small = jax.random.normal(k1, (2, 4, 16, 16), dtype=jnp.float32) * 50.0
    # Larger input to exercise the multi-block ("parallel") grid path.
    x_big = jax.random.normal(k2, (8, 4, 64, 64), dtype=jnp.float32) * 50.0
    # bf16 I/O (f32 in-kernel compute).
    x_bf16 = (jax.random.normal(k3, (2, 4, 16, 16), dtype=jnp.float32)
              * 50.0).astype(jnp.bfloat16)
    # Ragged element count (270 = 2*128 + 14): kernel body + plain-JAX tail.
    x_ragged = jax.random.normal(k1, (2, 3, 45), dtype=jnp.float32) * 50.0
    # Integer input: `/` -> float32, `//` -> int32 (PyTorch promotion).
    x_int = jax.random.randint(k2, (2, 4, 16, 16), -1000, 1000, dtype=jnp.int32)

    ok = True
    for is_train in (True, False):
        ok &= run_case(x_small, is_train)
        ok &= run_case(x_big, is_train)
        ok &= run_case(x_bf16, is_train, atol=0.5, rtol=1e-2)
        ok &= run_case(x_ragged, is_train)
        ok &= run_case(x_int, is_train)

    print("KERNEL_OK" if ok else "MISMATCH")
</pallas_src>

<mosaic_0001>
module attributes {stable_mosaic.version = 11 : i64} {
  func.func @_mapping_kernel(%arg0: i32, %arg1: memref<16x128xf32, #tpu.memory_space<vmem>>, %arg2: memref<16x128xf32, #tpu.memory_space<vmem>>) attributes {dimension_semantics = [#tpu.dimension_semantics<parallel>], iteration_bounds = array<i64: 1>, scalar_prefetch = 0 : i64, scratch_operands = 0 : i64, tpu.core_type = #tpu.core_type<tc>, window_params = [{transform_indices = @transform_0, window_bounds = array<i64: 16, 128>}, {transform_indices = @transform_1, window_bounds = array<i64: 16, 128>}]} {
    %c0 = arith.constant 0 : index
    %c0_0 = arith.constant 0 : index
    %0 = vector.load %arg1[%c0, %c0_0] : memref<16x128xf32, #tpu.memory_space<vmem>>, vector<16x128xf32>
    %cst = arith.constant 1.600000e+01 : f32
    %1 = vector.broadcast %cst : f32 to vector<16x128xf32>
    %2 = arith.divf %0, %1 : vector<16x128xf32>
    %cst_1 = arith.constant 5.000000e+00 : f32
    %3 = vector.broadcast %cst_1 : f32 to vector<16x128xf32>
    %4 = arith.addf %2, %3 : vector<16x128xf32>
    %cst_2 = arith.constant 1.000000e+01 : f32
    %5 = vector.broadcast %cst_2 : f32 to vector<16x128xf32>
    %6 = arith.mulf %4, %5 : vector<16x128xf32>
    %c0_3 = arith.constant 0 : index
    %c0_4 = arith.constant 0 : index
    %7 = vector.load %arg2[%c0_3, %c0_4] : memref<16x128xf32, #tpu.memory_space<vmem>>, vector<16x128xf32>
    tpu.vector_store %arg2[%c0_3, %c0_4], %6 {strides = array<i32>} : memref<16x128xf32, #tpu.memory_space<vmem>>, vector<16x128xf32>,
    return
  }
  func.func @transform_0(%arg0: i32) -> (i32, i32) {
    %c0_i32 = arith.constant 0 : i32
    %c0_i32_0 = arith.constant 0 : i32
    return %arg0, %c0_i32 : i32, i32
  }
  func.func @transform_1(%arg0: i32) -> (i32, i32) {
    %c0_i32 = arith.constant 0 : i32
    %c0_i32_0 = arith.constant 0 : i32
    return %arg0, %c0_i32 : i32, i32
  }
}

</mosaic_0001>

<bundles_post_ra>
// kernel: tpu_custom_call.1
= control target key start
LH: loop header
LB: loop body
LE: loop exit
PB: predicated region body
PF: predicated region fallthrough
CT: control target
= control target key end

     0   :  { %6 = vsyncpa [#allocation3], 0  ;;  %s147_s0 = inlined_call_operand.hbm [shape: f32[16,128], index: 0, kind: input, shape index: {}]   ;;  %s148_s1 = inlined_call_operand.hbm [shape: f32[16,128], index: 1, kind: output, shape index: {}]  }
   0x1   :  { %7 = vsyncpa [#allocation4], 0  ;;  %s103_s6 = smov [#allocation2]   ;;  %s55_s10 = scalar_lea.hbm %s147_s0, 256 }
   0x2   :  { %s13_s7 = sshll.u32 %s103_s6, 4  ;;  %p56_p0 = scmp.ne.s32.totalorder %s147_s0, %s55_s10  ;;  %s14_s7 = int_to_ptr.vmem [resolvable:$true] %s13_s7 }
   0x3   :  { %p59_p1 = scmp.lt.u32.totalorder %s55_s10, %s147_s0 }
   0x5   :  { %p61_p2 = pnand %p59_p1, %p56_p0 }
   0x7   :  { %64 = shalt.err (!%p61_p2)
}
   0x8   :  { %s65_s15 = scalar_lea.vmem %s14_s7, 256  ;;  %p70_p4 = scmp.lt.s32.totalorder %s14_s7, %s14_s7 }
   0x9   :  { %p66_p3 = scmp.ne.s32.totalorder %s14_s7, %s65_s15  ;;  %p71_p5 = scmp.lt.s32.totalorder %s65_s15, %s65_s15 }
   0xb   :  { %p72_p6 = por %p71_p5, %p70_p4 }
   0xd   :  { %p73_p7 = pnand %p72_p6, %p66_p3 }
   0xf   :  { %76 = shalt.err (!%p73_p7)
}
  0x10   :  { %s104_s16 = smov 128   ;;  %s105_s17 = smov 8  }
  0x11   :  { %19 = dma.hbm_to_vmem [thread:$0]  %s147_s0, 256, %s14_s7, [#allocation3], %s104_s16, %s104_s16, %s105_s17  }
  0x12   :  { %99 = dma.done.wait [#allocation3], 256  }
  0x13   :  { %100 = vsyncadd [#allocation3], 4294967040  ;;  %v23_v0 = vld [vmem:[#allocation2] sm:$0xff]  ;;  %v24_v1 = vld [vmem:[#allocation2 + $0x8] sm:$0xff]  ;;  %s106_s20 = smov [#allocation5]  }
  0x14   :  { %v26_v2 = vmul.f32 0.0625, %v23_v0  ;;  %v27_v3 = vmul.f32 0.0625, %v24_v1  ;;  %s39_s21 = sshll.u32 %s106_s20, 4  ;;  %s40_s21 = int_to_ptr.vmem [resolvable:$true] %s39_s21 }
  0x15   :  { %s77_s22 = scalar_lea.vmem %s40_s21, 256  ;;  %p82_p9 = scmp.lt.s32.totalorder %s40_s21, %s40_s21 }
  0x16   :  { %v28_v4 = vadd.f32 5.0, %v26_v2  ;;  %v29_v5 = vadd.f32 5.0, %v27_v3  ;;  %p78_p8 = scmp.ne.s32.totalorder %s40_s21, %s77_s22  ;;  %p83_p10 = scmp.lt.s32.totalorder %s77_s22, %s77_s22 }
  0x18   :  { %v30_v6 = vmul.f32 10.0, %v28_v4  ;;  %v31_v7 = vmul.f32 10.0, %v29_v5  ;;  %p84_p11 = por %p83_p10, %p82_p9 }
  0x1a   :  { %32 = vst [vmem:[#allocation5] sm:$0xff] %v30_v6  ;;  %33 = vst [vmem:[#allocation5 + $0x8] sm:$0xff] %v31_v7  ;;  %p85_p12 = pnand %p84_p11, %p78_p8 }
  0x1c   :  { %88 = shalt.err (!%p85_p12)
}
  0x1d   :  { %s89_s24 = scalar_lea.hbm %s148_s1, 256 }
  0x1e   :  { %p90_p13 = scmp.ne.s32.totalorder %s148_s1, %s89_s24  ;;  %p93_p0 = scmp.lt.u32.totalorder %s89_s24, %s148_s1 }
  0x20   :  { %p95_p1 = pnand %p93_p0, %p90_p13 }
  0x22   :  { %98 = shalt.err (!%p95_p1)
}
  0x23   :  { %45 = dma.vmem_to_hbm [thread:$0]  %s40_s21, 256, %s148_s1, [#allocation4], %s104_s16, %s104_s16, %s105_s17  }
  0x24   :  { %101 = dma.done.wait [#allocation4], 256  }
  0x25   :  { %102 = vsyncadd [#allocation4], 4294967040 }
  0x26   :  { %49 = vsyncpa [#allocation3], 1 }
  0x27   :  { %50 = vsyncpa [#allocation4], 1 }

</bundles_post_ra>
